<compile_context>
chip_gen: v5e
topology: v5e:2x2
jax: 0.10.0
libtpu: 0.0.40
codegen_flags: <defaults>
</compile_context>

<pallas_src>
import functools

import jax
import jax.numpy as jnp
from jax.experimental import pallas as pl
from jax.experimental.pallas import tpu as pltpu

_VMEM_LIMIT_BYTES = 32 * 1024 * 1024  # safe on v5e/v6e/v7x scoped VMEM


def _pick_hw_tile(hw, c, itemsize, max_hw_tile=None):
    """Largest lane-dense (multiple of 128) tile of HW under a ~2MiB block budget."""
    if hw % 128 != 0:
        # TODO(synk): for HW not a multiple of 128 (e.g. 7x7, 14x14) a lane-dense
        # relayout (NHWC) upstream would avoid masked stores; fall back to full rows.
        return hw
    budget = 2 * 1024 * 1024
    cap = max(512, (budget // max(1, c * itemsize)) // 128 * 128)
    if max_hw_tile is not None:
        cap = min(cap, max(128, (max_hw_tile // 128) * 128))
    t = max(128, min(hw, cap) // 128 * 128)
    while hw % t != 0:
        t -= 128
    return t


def _eca_gate_kernel(c, hw, k_size, pad, w_ref, x_ref, gate_ref, acc_ref):
    """Pool + k-tap channel conv + sigmoid -> gate (1, 1, C).

    w_ref:   (k,) conv taps in SMEM (scalar prefetch)
    x_ref:   (1, C, HW_TILE) input block
    gate_ref:(1, 1, C) f32 output (written on last spatial tile)
    acc_ref: (1, C + 2*pad) f32 scratch, zero-padded channel sum accumulator
    """
    t = pl.program_id(1)

    @pl.when(t == 0)
    def _init():
        acc_ref[...] = jnp.zeros_like(acc_ref)

    # Accumulate spatial sums in f32 (robust for bf16 inputs, large HW).
    psum = jnp.sum(x_ref[...].astype(jnp.float32), axis=-1)  # (1, C)
    acc_ref[:, pad:pad + c] += psum

    @pl.when(t == pl.num_programs(1) - 1)
    def _finalize():
        # Conv1d (cross-correlation, zero padding) as k shifted FMAs on the
        # zero-padded pooled sums; divide by HW at the end (conv is linear).
        conv = jnp.zeros((1, c), jnp.float32)
        for j in range(k_size):
            conv = conv + w_ref[j] * acc_ref[:, j:j + c]
        gate = jax.nn.sigmoid(conv * (1.0 / float(hw)))       # (1, C)
        gate_ref[...] = gate[:, None, :]                       # (1, 1, C)


def _eca_apply_kernel(c, gate_ref, x_ref, o_ref):
    """Elementwise x * sigmoid-gate, broadcast over the spatial (lane) axis."""
    g = gate_ref[...].reshape(1, c)                            # (1, C) f32
    x = x_ref[...].astype(jnp.float32)                         # (1, C, HW_TILE)
    o_ref[...] = (x * g[:, :, None]).astype(o_ref.dtype)


@functools.partial(jax.jit, static_argnames=("k_size", "max_hw_tile"))
def eca_forward(x, conv_weight, k_size=3, max_hw_tile=None):
    """x: (B, C, H, W); conv_weight: (1, 1, k) (PyTorch Conv1d(1,1,k), no bias)."""
    B, C, H, W = x.shape
    HW = H * W
    pad = (k_size - 1) // 2
    itemsize = x.dtype.itemsize

    w = conv_weight.reshape(k_size).astype(jnp.float32)
    x_flat = x.reshape(B, C, HW)

    hw_tile = _pick_hw_tile(HW, C, itemsize, max_hw_tile)
    T = HW // hw_tile

    # ---- Kernel A: pooled sums -> channel conv -> sigmoid gate (B, 1, C) ----
    gate = pl.pallas_call(
        functools.partial(_eca_gate_kernel, C, HW, k_size, pad),
        out_shape=jax.ShapeDtypeStruct((B, 1, C), jnp.float32),
        grid_spec=pltpu.PrefetchScalarGridSpec(
            num_scalar_prefetch=1,
            grid=(B, T),
            in_specs=[
                pl.BlockSpec((1, C, hw_tile), lambda b, t, w: (b, 0, t)),
            ],
            out_specs=pl.BlockSpec((1, 1, C), lambda b, t, w: (b, 0, 0)),
            scratch_shapes=[pltpu.VMEM((1, C + 2 * pad), jnp.float32)],
        ),
        compiler_params=pltpu.CompilerParams(
            dimension_semantics=("parallel", "arbitrary"),
            vmem_limit_bytes=_VMEM_LIMIT_BYTES),
        cost_estimate=pl.CostEstimate(
            flops=int(B * C * HW + B * C * k_size),
            transcendentals=int(B * C),
            bytes_accessed=int(B * C * HW * itemsize + B * C * 4 + k_size * 4)),
    )(w, x_flat)

    # ---- Kernel B: elementwise gating, lane-dense tiles over (B, HW) ----
    out_flat = pl.pallas_call(
        functools.partial(_eca_apply_kernel, C),
        out_shape=jax.ShapeDtypeStruct((B, C, HW), x.dtype),
        grid_spec=pltpu.PrefetchScalarGridSpec(
            num_scalar_prefetch=0,
            grid=(B, T),
            in_specs=[
                pl.BlockSpec((1, 1, C), lambda b, t: (b, 0, 0)),
                pl.BlockSpec((1, C, hw_tile), lambda b, t: (b, 0, t)),
            ],
            out_specs=pl.BlockSpec((1, C, hw_tile), lambda b, t: (b, 0, t)),
        ),
        compiler_params=pltpu.CompilerParams(
            dimension_semantics=("parallel", "parallel"),
            vmem_limit_bytes=_VMEM_LIMIT_BYTES),
        cost_estimate=pl.CostEstimate(
            flops=int(B * C * HW),
            transcendentals=0,
            bytes_accessed=int(2 * B * C * HW * itemsize + B * C * 4)),
    )(gate, x_flat)

    return out_flat.reshape(B, C, H, W)


def _eca_reference(x, conv_weight, k_size=3):
    """Pure-JAX reference mirroring the PyTorch forward."""
    B, C, H, W = x.shape
    pad = (k_size - 1) // 2
    w = conv_weight.reshape(k_size)
    y = jnp.mean(x.astype(jnp.float32), axis=(2, 3))   # (B, C)  -- avg_pool(1)
    y_pad = jnp.pad(y, ((0, 0), (pad, pad)))           # zero padding along channels
    conv = jnp.zeros_like(y)
    for j in range(k_size):
        conv = conv + w[j] * y_pad[:, j:j + C]          # cross-correlation (Conv1d)
    gate = jax.nn.sigmoid(conv)                         # (B, C)
    return (x.astype(jnp.float32) * gate[:, :, None, None]).astype(x.dtype)


if __name__ == "__main__":
    key = jax.random.PRNGKey(0)
    kx, kw, kx2 = jax.random.split(key, 3)

    B, C, H, W = 2, 4, 16, 16
    k_size = 3

    x = jax.random.normal(kx, (B, C, H, W), dtype=jnp.float32)
    # Deterministic synthetic Conv1d(1, 1, k_size, bias=False) weight.
    conv_weight = jax.random.normal(kw, (1, 1, k_size), dtype=jnp.float32) * 0.5

    out = jax.block_until_ready(eca_forward(x, conv_weight, k_size=k_size))
    ref = _eca_reference(x, conv_weight, k_size=k_size)
    assert out.shape == (B, C, H, W)
    assert jnp.allclose(out, ref, atol=1e-5, rtol=1e-5), "mismatch vs reference"

    # Second config exercising the multi-tile spatial accumulation path
    # (HW = 1024 split into 4 lane-dense tiles of 256).
    x2 = jax.random.normal(kx2, (2, 8, 32, 32), dtype=jnp.float32)
    out2 = jax.block_until_ready(
        eca_forward(x2, conv_weight, k_size=k_size, max_hw_tile=256))
    ref2 = _eca_reference(x2, conv_weight, k_size=k_size)
    assert jnp.allclose(out2, ref2, atol=1e-5, rtol=1e-5), "mismatch vs reference (tiled)"

    print("KERNEL_OK")
</pallas_src>

<mosaic_0001>
module attributes {stable_mosaic.version = 11 : i64} {
  func.func @_eca_gate_kernel(%arg0: i32, %arg1: i32, %arg2: memref<3xf32, #tpu.memory_space<smem>>, %arg3: memref<1x4x256xf32, #tpu.memory_space<vmem>>, %arg4: memref<1x1x4xf32, #tpu.memory_space<vmem>>, %arg5: memref<1x6xf32, #tpu.memory_space<vmem>>) attributes {dimension_semantics = [#tpu.dimension_semantics<parallel>, #tpu.dimension_semantics<arbitrary>], iteration_bounds = array<i64: 2, 1>, scalar_prefetch = 1 : i64, scratch_operands = 1 : i64, tpu.core_type = #tpu.core_type<tc>, window_params = [{transform_indices = @transform_0, window_bounds = array<i64: 1, 4, 256>}, {transform_indices = @transform_1, window_bounds = array<i64: 1, 1, 4>}]} {
    %c0_i32 = arith.constant 0 : i32
    %0 = arith.cmpi eq, %arg1, %c0_i32 : i32
    %1 = arith.extui %0 : i1 to i32
    %c0_i32_0 = arith.constant 0 : i32
    %2 = arith.cmpi ne, %1, %c0_i32_0 : i32
    scf.if %2 {
      %cst_8 = arith.constant 0.000000e+00 : f32
      %11 = vector.broadcast %cst_8 : f32 to vector<1x6xf32>
      %c0_9 = arith.constant 0 : index
      %c0_10 = arith.constant 0 : index
      %12 = vector.load %arg5[%c0_9, %c0_10] : memref<1x6xf32, #tpu.memory_space<vmem>>, vector<1x6xf32>
      tpu.vector_store %arg5[%c0_9, %c0_10], %11 {strides = array<i32>} : memref<1x6xf32, #tpu.memory_space<vmem>>, vector<1x6xf32>,
    } else {
    }
    %c0 = arith.constant 0 : index
    %c0_1 = arith.constant 0 : index
    %c0_2 = arith.constant 0 : index
    %3 = vector.load %arg3[%c0, %c0_1, %c0_2] : memref<1x4x256xf32, #tpu.memory_space<vmem>>, vector<1x4x256xf32>
    %cst = arith.constant dense<0.000000e+00> : vector<1x4xf32>
    %4 = vector.multi_reduction <add>, %3, %cst [2] : vector<1x4x256xf32> to vector<1x4xf32>
    %c0_3 = arith.constant 0 : index
    %c1 = arith.constant 1 : index
    %5 = vector.load %arg5[%c0_3, %c1] : memref<1x6xf32, #tpu.memory_space<vmem>>, vector<1x4xf32>
    %6 = arith.addf %5, %4 : vector<1x4xf32>
    %c0_4 = arith.constant 0 : index
    %c1_5 = arith.constant 1 : index
    %7 = vector.load %arg5[%c0_4, %c1_5] : memref<1x6xf32, #tpu.memory_space<vmem>>, vector<1x4xf32>
    tpu.vector_store %arg5[%c0_4, %c1_5], %6 {strides = array<i32>} : memref<1x6xf32, #tpu.memory_space<vmem>>, vector<1x4xf32>,
    %c0_i32_6 = arith.constant 0 : i32
    %8 = arith.cmpi eq, %arg1, %c0_i32_6 : i32
    %9 = arith.extui %8 : i1 to i32
    %c0_i32_7 = arith.constant 0 : i32
    %10 = arith.cmpi ne, %9, %c0_i32_7 : i32
    scf.if %10 {
      %cst_8 = arith.constant 0.000000e+00 : f32
      %11 = vector.broadcast %cst_8 : f32 to vector<1x4xf32>
      %c0_9 = arith.constant 0 : index
      %12 = memref.load %arg2[%c0_9] : memref<3xf32, #tpu.memory_space<smem>>
      %c0_10 = arith.constant 0 : index
      %c0_11 = arith.constant 0 : index
      %13 = vector.load %arg5[%c0_10, %c0_11] : memref<1x6xf32, #tpu.memory_space<vmem>>, vector<1x4xf32>
      %14 = vector.broadcast %12 : f32 to vector<1x4xf32>
      %15 = arith.mulf %14, %13 : vector<1x4xf32>
      %16 = arith.addf %11, %15 : vector<1x4xf32>
      %c1_12 = arith.constant 1 : index
      %17 = memref.load %arg2[%c1_12] : memref<3xf32, #tpu.memory_space<smem>>
      %c0_13 = arith.constant 0 : index
      %c1_14 = arith.constant 1 : index
      %18 = vector.load %arg5[%c0_13, %c1_14] : memref<1x6xf32, #tpu.memory_space<vmem>>, vector<1x4xf32>
      %19 = vector.broadcast %17 : f32 to vector<1x4xf32>
      %20 = arith.mulf %19, %18 : vector<1x4xf32>
      %21 = arith.addf %16, %20 : vector<1x4xf32>
      %c2 = arith.constant 2 : index
      %22 = memref.load %arg2[%c2] : memref<3xf32, #tpu.memory_space<smem>>
      %c0_15 = arith.constant 0 : index
      %c2_16 = arith.constant 2 : index
      %23 = vector.load %arg5[%c0_15, %c2_16] : memref<1x6xf32, #tpu.memory_space<vmem>>, vector<1x4xf32>
      %24 = vector.broadcast %22 : f32 to vector<1x4xf32>
      %25 = arith.mulf %24, %23 : vector<1x4xf32>
      %26 = arith.addf %21, %25 : vector<1x4xf32>
      %cst_17 = arith.constant 3.906250e-03 : f32
      %27 = vector.broadcast %cst_17 : f32 to vector<1x4xf32>
      %28 = arith.mulf %26, %27 : vector<1x4xf32>
      %29 = arith.negf %28 : vector<1x4xf32>
      %30 = math.exp %29 : vector<1x4xf32>
      %cst_18 = arith.constant 1.000000e+00 : f32
      %31 = vector.broadcast %cst_18 : f32 to vector<1x4xf32>
      %32 = arith.addf %31, %30 : vector<1x4xf32>
      %33 = arith.divf %31, %32 : vector<1x4xf32>
      %34 = vector.shape_cast %33 : vector<1x4xf32> to vector<1x1x4xf32>
      %c0_19 = arith.constant 0 : index
      %c0_20 = arith.constant 0 : index
      %c0_21 = arith.constant 0 : index
      %35 = vector.load %arg4[%c0_19, %c0_20, %c0_21] : memref<1x1x4xf32, #tpu.memory_space<vmem>>, vector<1x1x4xf32>
      tpu.vector_store %arg4[%c0_19, %c0_20, %c0_21], %34 {strides = array<i32>} : memref<1x1x4xf32, #tpu.memory_space<vmem>>, vector<1x1x4xf32>,
    } else {
    }
    return
  }
  func.func @transform_0(%arg0: i32, %arg1: i32, %arg2: memref<3xf32, #tpu.memory_space<smem>>) -> (i32, i32, i32) {
    %c0_i32 = arith.constant 0 : i32
    %c0_i32_0 = arith.constant 0 : i32
    return %arg0, %c0_i32, %arg1 : i32, i32, i32
  }
  func.func @transform_1(%arg0: i32, %arg1: i32, %arg2: memref<3xf32, #tpu.memory_space<smem>>) -> (i32, i32, i32) {
    %c0_i32 = arith.constant 0 : i32
    %c0_i32_0 = arith.constant 0 : i32
    %c0_i32_1 = arith.constant 0 : i32
    return %arg0, %c0_i32, %c0_i32_0 : i32, i32, i32
  }
}

module attributes {stable_mosaic.version = 11 : i64} {
  func.func @_eca_apply_kernel(%arg0: i32, %arg1: i32, %arg2: memref<1x1x4xf32, #tpu.memory_space<vmem>>, %arg3: memref<1x4x256xf32, #tpu.memory_space<vmem>>, %arg4: memref<1x4x256xf32, #tpu.memory_space<vmem>>) attributes {dimension_semantics = [#tpu.dimension_semantics<parallel>, #tpu.dimension_semantics<parallel>], iteration_bounds = array<i64: 2, 1>, scalar_prefetch = 0 : i64, scratch_operands = 0 : i64, tpu.core_type = #tpu.core_type<tc>, window_params = [{transform_indices = @transform_0, window_bounds = array<i64: 1, 1, 4>}, {transform_indices = @transform_1, window_bounds = array<i64: 1, 4, 256>}, {transform_indices = @transform_2, window_bounds = array<i64: 1, 4, 256>}]} {
    %c0 = arith.constant 0 : index
    %c0_0 = arith.constant 0 : index
    %c0_1 = arith.constant 0 : index
    %0 = vector.load %arg2[%c0, %c0_0, %c0_1] : memref<1x1x4xf32, #tpu.memory_space<vmem>>, vector<1x1x4xf32>
    %1 = vector.shape_cast %0 : vector<1x1x4xf32> to vector<1x4xf32>
    %c0_2 = arith.constant 0 : index
    %c0_3 = arith.constant 0 : index
    %c0_4 = arith.constant 0 : index
    %2 = vector.load %arg3[%c0_2, %c0_3, %c0_4] : memref<1x4x256xf32, #tpu.memory_space<vmem>>, vector<1x4x256xf32>
    %3 = vector.shape_cast %1 : vector<1x4xf32> to vector<1x4x1xf32>
    %4 = vector.broadcast %3 : vector<1x4x1xf32> to vector<1x4x256xf32>
    %5 = arith.mulf %2, %4 : vector<1x4x256xf32>
    %c0_5 = arith.constant 0 : index
    %c0_6 = arith.constant 0 : index
    %c0_7 = arith.constant 0 : index
    %6 = vector.load %arg4[%c0_5, %c0_6, %c0_7] : memref<1x4x256xf32, #tpu.memory_space<vmem>>, vector<1x4x256xf32>
    tpu.vector_store %arg4[%c0_5, %c0_6, %c0_7], %5 {strides = array<i32>} : memref<1x4x256xf32, #tpu.memory_space<vmem>>, vector<1x4x256xf32>,
    return
  }
  func.func @transform_0(%arg0: i32, %arg1: i32) -> (i32, i32, i32) {
    %c0_i32 = arith.constant 0 : i32
    %c0_i32_0 = arith.constant 0 : i32
    %c0_i32_1 = arith.constant 0 : i32
    return %arg0, %c0_i32, %c0_i32_0 : i32, i32, i32
  }
  func.func @transform_1(%arg0: i32, %arg1: i32) -> (i32, i32, i32) {
    %c0_i32 = arith.constant 0 : i32
    %c0_i32_0 = arith.constant 0 : i32
    return %arg0, %c0_i32, %arg1 : i32, i32, i32
  }
  func.func @transform_2(%arg0: i32, %arg1: i32) -> (i32, i32, i32) {
    %c0_i32 = arith.constant 0 : i32
    %c0_i32_0 = arith.constant 0 : i32
    return %arg0, %c0_i32, %arg1 : i32, i32, i32
  }
}

</mosaic_0001>

<bundles_post_ra>
// kernel: eca_forward.3
= control target key start
LH: loop header
LB: loop body
LE: loop exit
PB: predicated region body
PF: predicated region fallthrough
CT: control target
= control target key end

     0   :  { %s390_s9 = smov 0   ;;  %s392_s10 = smov 0   ;;  %s423_s0 = inlined_call_operand.vmem [shape: f32[2,1,4], index: 0, kind: input, shape index: {}]   ;;  %s424_s1 = inlined_call_operand.vmem [shape: f32[2,4,256], index: 1, kind: input, shape index: {}]   ;;  %s425_s2 = inlined_call_operand.vmem [shape: f32[2,4,256], index: 2, kind: output, shape index: {}]  }
   0x1   :  { %s394_s11 = smov 0  }
   0x2 LB: > { %s24_s12 = sadd.s32 1, %s368_s10  ;;  %p314_p0 = scmp.ge.s32.totalorder %s372_s11, 1  ;;  %s372_s11 = sphi %s394_s11, %s12_s11   ;;  %s368_s10 = sphi %s392_s10, %s427_s10   ;;  %s364_s9 = sphi %s390_s9, %s426_s9  }
   0x3   : > { %p26_p1 = scmp.ge.s32.totalorder %s24_s12, 2  ;;  %p141_p2 = scmp.lt.s32.totalorder %s372_s11, 3 }
   0x5   : > { %s429_s12 = smov (%p26_p1, %s24_s12), 0  ;;  %p142_p3 = pnand %p314_p0, %p141_p2 }
   0x6   : > { %p174_p4 = scmp.lt.s32.totalorder (!%p142_p3), %s364_s9, 1 }
   0x7   : > { %145 = sbr.rel (%p142_p3) target bundleno = 144 (0x90), region = 28 }
   0xc   : > { %v200_v0 = vlaneseq  ;;  %s431_s9 = smov (!%p174_p4, %s364_s9), 1  ;;  %v374_v3 = vmov 839922192  }
   0xd   : > { %s176_s15 = scalar_lea.vmem %s423_s0, %s431_s9  ;;  %v208_v4 = vunpack.c.l.s4 %v374_v3  ;;  %s321_s16 = sshll.u32 %s431_s9, 3 }
   0xe   : > { %v201_v1 = vshrl.u32 %v200_v0, 7  ;;  %v349_v2 = vld [vmem:[%s176_s15] ss:$0 sm:$0xff]  ;;  %s185_s19 = scalar_lea.vmem %s424_s1, %s321_s16  ;;  %s195_s22 = scalar_lea.vmem %s425_s2, %s321_s16 }
   0xf   : > { %v209_v5 = vunpack.c.0.s8 %v208_v4  ;;  %v198_v6 = vld [vmem:[%s185_s19] sm:$0xff] }
  0x10   : > { %348 = vset.pattern.permute.xlu0 %v201_v1 }
  0x18   : > { %204 = vperm.xlu0 %348, %v349_v2  }
  0x8a   : > { %v205_v7 = vpop.permute.xlu0 %204 }
  0x8b   : > { %v210_v8 = vperm.slane %v205_v7, %v209_v5 }
  0x8d   : > { %v212_v9 = vmul.f32 %v210_v8, %v198_v6 }
  0x8f   : > { %213 = vst [vmem:[%s195_s22] sm:$0xff] %v212_v9 }
  0x90 PF: > { %s12_s11 = sadd.s32 1, %s372_s11   ;;  %s426_s9 = smov %s368_s10 }
  0x91   : > { %p9_p5 = scmp.ge.s32.totalorder %s12_s11, 4   ;;  %s427_s10 = smov %s429_s12 }
  0x93   :  { %11 = sbr.rel (!%p9_p5) target bundleno = 2 (0x2), region = 61 }

// kernel: eca_forward.2
= control target key start
LH: loop header
LB: loop body
LE: loop exit
PB: predicated region body
PF: predicated region fallthrough
CT: control target
= control target key end

     0   :  { %s386_s12 = smov [#allocation4]   ;;  %s446_s0 = inlined_call_operand.vmem [shape: f32[3], index: 0, kind: input, shape index: {}]   ;;  %s447_s1 = inlined_call_operand.vmem [shape: f32[2,4,256], index: 1, kind: input, shape index: {}]   ;;  %s448_s2 = inlined_call_operand.vmem [shape: f32[2,1,4], index: 2, kind: output, shape index: {}]  }
   0x1   :  { %s8_s11 = sshll.u32 %s446_s0, 4  ;;  %s9_s11 = int_to_ptr.vmem [resolvable:$true] %s8_s11 }
   0x2   :  { %11 = dma.vmem_to_smem %s9_s11, 16, %s386_s12, [#allocation3] }
   0x3   :  { %372 = dma.done.wait [#allocation3], 16 }
   0x4   :  { %373 = vsyncadd [#allocation3], 4294967280 }
   0x5   :  { %14 = sfence }
   0x6   :  { %s409_s13 = smov 0   ;;  %s411_s14 = smov 0  }
   0x7   :  { %s413_s15 = smov 0  }
   0x8 LB: > { %s32_s0 = sadd.s32 1, %s380_s14  ;;  %p305_p0 = scmp.ge.s32.totalorder %s384_s15, 1  ;;  %s384_s15 = sphi %s413_s15, %s20_s15   ;;  %s380_s14 = sphi %s411_s14, %s450_s14   ;;  %s376_s13 = sphi %s409_s13, %s449_s13  }
   0x9   : > { %p34_p1 = scmp.ge.s32.totalorder %s32_s0, 2  ;;  %p115_p2 = scmp.lt.s32.totalorder %s384_s15, 3 }
   0xb   : > { %s452_s0 = smov (%p34_p1, %s32_s0), 0  ;;  %p116_p3 = pnand %p305_p0, %p115_p2 }
   0xc   : > { %p138_p4 = scmp.lt.s32.totalorder (!%p116_p3), %s376_s13, 1  ;;  %s308_s20 = sld [smem:[#allocation4 + $0x1]] (!%p116_p3) }
   0xd   : > { %119 = sbr.rel (%p116_p3) target bundleno = 447 (0x1bf), region = 24  ;;  %s309_s21 = sld [smem:[#allocation4 + $0x2]] (!%p116_p3) }
   0xe   : > { %s389_s22 = smov (!%p116_p3), 127   ;;  %s390_s23 = smov (!%p116_p3), 126  }
   0xf   : > { %s197_s24 = sld [smem:[#allocation4]] (!%p116_p3) }
  0x12   : > { %s454_s13 = smov (!%p138_p4, %s376_s13), 1  ;;  %vm163_vm0 = vcmask 1043456   ;;  %v387_v6 = vmov 0   ;;  %vm154_vm1 = vcmask 40960   ;;  %v388_v7 = vmov 0.0  }
  0x13   : > { %s313_s16 = sshll.u32 %s454_s13, 3  ;;  %343 = vset.pattern.permute.xlu0 %v387_v6  ;;  %155 = vst.msk [vmem:[#allocation2] sm:$0x1] %vm154_vm1, %v388_v7  ;;  %v186_v14 = vlaneseq  ;;  %vm192_vm2 = vcmask 32776   ;;  %v203_v21 = vstv %s308_s20  ;;  %v211_v24 = vstv %s309_s21  ;;  %s149_s27 = scalar_lea.vmem %s448_s2, %s454_s13 }
  0x14   : > { %s145_s19 = scalar_lea.vmem %s447_s1, %s313_s16  ;;  %vm238_vm5 = vcmask 24576  }
  0x15   : > { %v156_v0 = vld [vmem:[%s145_s19] sm:$0xff]  ;;  %v187_v15 = vand.u32 127, %v186_v14  ;;  %v199_v27 = vstv %s197_s24 }
  0x16   : > { %158 = vst [vmem:[#allocation1] ss:$2 sm:$0xff] %v156_v0 }
  0x17   : > { %v188_v16 = vadd.s32 4294967295, %v187_v15 }
  0x1a   : > { %v169_v17 = vld [vmem:[#allocation2] sm:$0x1] }
  0x1d   : > { %v159_v1 = vld.sshfl [vmem:[#allocation1] sm:$0xff pattern:$0x75316420]  ;;  %v160_v2 = vld.sshfl [vmem:[#allocation1 + $0x8] sm:$0xff pattern:$0x75316420] }
  0x1e   : > { %v164_v3 = vsel %vm163_vm0, %v159_v1, 0.0  ;;  %v165_v4 = vsel %vm163_vm0, %v160_v2, 0.0 }
  0x1f   : > { %v166_v5 = vadd.f32 %v165_v4, %v164_v3 }
  0x21   : > { %167 = vadd.xlane.f32.xlu0 %v166_v5 }
  0x94   : > { %v168_v8 = vpop.xlane.xlu0 %167 }
  0x95   : > { %v171_v9 = vperm.slane %v168_v8, 0  ;;  %v172_v10 = vperm.slane %v168_v8, 1  ;;  %v173_v11 = vperm.slane %v168_v8, 2  ;;  %v174_v12 = vperm.slane %v168_v8, 3 }
  0x97   : > { %175 = vst [vmem:[#allocation1] ss:$9 sm:$0xff] %v171_v9 }
  0x98   : > { %177 = vst [vmem:[#allocation1 + $0x1] ss:$9 sm:$0xff] %v172_v10 }
  0x99   : > { %179 = vst [vmem:[#allocation1 + $0x2] ss:$9 sm:$0xff] %v173_v11 }
  0x9a   : > { %181 = vst [vmem:[#allocation1 + $0x3] ss:$9 sm:$0xff] %v174_v12 }
  0xa1   : > { %v182_v13 = vld [vmem:[#allocation1] sm:$0xff] }
  0xa2   : > { %184 = vperm.xlu0 %343, %v182_v13  }
 0x114   : > { %v185_v18 = vpop.permute.xlu0 %184 }
 0x115   : > { %v189_v19 = vperm.slane %v185_v18, %v188_v16 }
 0x117   : > { %v191_v20 = vadd.f32 %v189_v19, %v169_v17 }
 0x119   : > { %193 = vst.msk [vmem:[#allocation2] sm:$0x1] %vm192_vm2, %v191_v20 }
 0x120   : > { %v198_v22 = vld [vmem:[#allocation2] sm:$0x1] }
 0x121   : > { %v204_v23 = vmul.f32 %v203_v21, %v198_v22  ;;  %v212_v25 = vmul.f32 %v211_v24, %v198_v22  ;;  %v200_v28 = vmul.f32 %v199_v27, %v198_v22 }
 0x123   : > { %206 = vrot.lane.b32.xlu1 %v204_v23, %s389_s22 }
 0x12b   : > { %214 = vrot.lane.b32.xlu1 %v212_v25, %s390_s23 }
 0x195   : > { %v207_v26 = vpop.permute.xlu1 %206 }
 0x196   : > { %v209_v29 = vadd.f32 %v207_v26, %v200_v28 }
 0x19d   : > { %v215_v30 = vpop.permute.xlu1 %214 }
 0x19e   : > { %v217_v31 = vadd.f32 %v215_v30, %v209_v29 }
 0x1a0   : > { %v310_v32 = vmul.f32 -0.00390625, %v217_v31 }
 0x1a2   : > { %v220_v33 = vmul.f32 1.442695, %v310_v32 }
 0x1a4   : > { %344 = vpow2.f32 %v220_v33 }
 0x1aa   : > { %v345_v34 = vpop.eup %344 }
 0x1ab   : > { %v222_v35 = vadd.f32 1.0, %v345_v34 }
 0x1ad   : > { %346 = vrcp.f32 %v222_v35  ;;  %v234_v39 = vand.u32 2147483648, %v222_v35  ;;  %v232_v41 = vand.u32 2147483647, %v222_v35  ;;  %vm228_vm4 = vweird.f32 %v222_v35 }
 0x1af   : > { %v235_v43 = vor.u32 1.1754944e-38, %v234_v39  ;;  %vm233_vm7 = vcmp.eq.f32.partialorder %v232_v41, 8.507059e+37 }
 0x1b3   : > { %v347_v36 = vpop.eup %346 }
 0x1b4   : > { %v224_v37 = vmul.f32 %v347_v36, %v222_v35  ;;  %vm229_vm3 = vweird.f32 %v347_v36 }
 0x1b5   : > { %vm230_vm6 = vmor %vm228_vm4, %vm229_vm3 }
 0x1b6   : > { %v225_v38 = vsub.f32 1.0, %v224_v37 }
 0x1b8   : > { %v226_v40 = vmul.f32 %v347_v36, %v225_v38 }
 0x1ba   : > { %v227_v42 = vadd.f32 %v347_v36, %v226_v40 }
 0x1bc   : > { %v231_v44 = vsel %vm230_vm6, %v347_v36, %v227_v42 }
 0x1bd   : > { %v236_v45 = vsel %vm233_vm7, %v235_v43, %v231_v44 }
 0x1be   : > { %239 = vst.msk [vmem:[%s149_s27] sm:$0x1] %vm238_vm5, %v236_v45 }
 0x1bf PF: > { %s20_s15 = sadd.s32 1, %s384_s15   ;;  %s449_s13 = smov %s380_s14 }
 0x1c0   : > { %p17_p5 = scmp.ge.s32.totalorder %s20_s15, 4   ;;  %s450_s14 = smov %s452_s0 }
 0x1c2   :  { %19 = sbr.rel (!%p17_p5) target bundleno = 8 (0x8), region = 65 }

</bundles_post_ra>
